<compile_context>
chip_gen: v7x
topology: tpu7x:2x2x1
jax: 0.10.0
libtpu: 0.0.40
codegen_flags: <defaults>
</compile_context>

<pallas_src>
import jax
import jax.numpy as jnp
from jax import lax
from jax.experimental import pallas as pl
from jax.experimental.pallas import tpu as pltpu

MARGIN = 1.5
EPS = 1e-6

_LANE = 128
_PER_INPUT_TILE_BYTES = 4 * 1024 * 1024     # per input, per pipeline buffer
_VMEM_LIMIT_BYTES = 48 * 1024 * 1024        # > v5e 16MiB default, < v7x 64MiB phys


def _round_up(x, m):
    return ((x + m - 1) // m) * m


def _sublane_multiple(dtype):
    # Native sublane tile: f32 -> 8, bf16 -> 16, int8/fp8 -> 32.
    return 8 * max(1, 4 // jnp.dtype(dtype).itemsize)


def _make_kernel(n_rows, tile_rows, margin, eps):
    def kernel(o1_ref, o2_ref, lbl_ref, out_ref):
        i = pl.program_id(0)
        # Upcast after the (possibly bf16) load; all math in f32.
        o1 = o1_ref[...].astype(jnp.float32)                     # (T, D)
        o2 = o2_ref[...].astype(jnp.float32)
        diff = o1 - o2 + eps                                     # VPU
        sq = diff * diff                                         # VPU
        # D-reduction on the idle MXU; result lands rows on the lane axis so
        # the whole epilogue is lane-dense ((1, T): T/128 vregs).
        ones = jnp.ones((8, sq.shape[-1]), jnp.float32)
        ssum = lax.dot_general(ones, sq, (((1,), (1,)), ((), ())),
                               preferred_element_type=jnp.float32)  # (8, T)
        sq_sum = ssum[0:1, :]                                    # (1, T)
        dist = jnp.sqrt(sq_sum)                                  # EUP, lane-dense
        lbl = lbl_ref[...]                                       # (1, T) f32
        hinge = jnp.maximum(margin - dist, 0.0)
        # Reuse sq_sum directly for the (1-label)*d^2 term.
        per_row = (1.0 - lbl) * sq_sum + lbl * (hinge * hinge)
        # Mask tail rows with a true select (padded rows may hold garbage/NaN).
        col = i * tile_rows + lax.broadcasted_iota(jnp.int32, per_row.shape, 1)
        out_ref[...] = jnp.where(col < n_rows, per_row, 0.0)
    return kernel


def contrastive_loss(output1, output2, label, *, margin=MARGIN, eps=EPS,
                     tile_rows=None):
    """output1/output2: (N, D) f32 or bf16; label: (N,). Returns scalar f32."""
    N, D = output1.shape
    itemsize = jnp.dtype(output1.dtype).itemsize
    mult = _sublane_multiple(output1.dtype)
    full_rows = _round_up(N, mult)          # rows of a single tile covering all

    if tile_rows is None:
        tn = _PER_INPUT_TILE_BYTES // max(1, D * itemsize)
        tn = max(_LANE, (tn // _LANE) * _LANE)
        # Keep >=4 grid steps when N allows it so v7x's 2 TCs can split work.
        tn = min(tn, max(_LANE, _round_up(pl.cdiv(N, 4), _LANE)))
        tile_rows = tn
    else:
        tile_rows = max(mult, _round_up(int(tile_rows), mult))

    if tile_rows >= full_rows:
        tile_rows = full_rows               # single tile: blocks == full dims
    else:
        # Multi-tile: lane-dense label/output blocks require tile_rows % 128 == 0.
        tile_rows = max(_LANE, (tile_rows // _LANE) * _LANE)

    num_tiles = pl.cdiv(N, tile_rows)
    padded = num_tiles * tile_rows

    # Lane-dense label stream (1, padded); padded entries are zero.
    label_lane = jnp.zeros((1, padded), jnp.float32)
    label_lane = label_lane.at[0, :N].set(label.reshape(-1).astype(jnp.float32))

    kernel = _make_kernel(N, tile_rows, float(margin), float(eps))
    per_row = pl.pallas_call(
        kernel,
        out_shape=jax.ShapeDtypeStruct((1, padded), jnp.float32),
        grid=(num_tiles,),
        in_specs=[
            pl.BlockSpec((tile_rows, D), lambda i: (i, 0)),
            pl.BlockSpec((tile_rows, D), lambda i: (i, 0)),
            pl.BlockSpec((1, tile_rows), lambda i: (0, i)),
        ],
        out_specs=pl.BlockSpec((1, tile_rows), lambda i: (0, i)),
        compiler_params=pltpu.CompilerParams(
            dimension_semantics=("parallel",),
            vmem_limit_bytes=_VMEM_LIMIT_BYTES),
        cost_estimate=pl.CostEstimate(
            flops=2 * 8 * N * D + 4 * N * D,
            transcendentals=N,
            bytes_accessed=2 * N * D * itemsize + 2 * padded * 4),
    )(output1, output2, label_lane)

    # Tiny epilogue: masked/padded entries are zero, so sum/N is the exact mean.
    return jnp.sum(per_row) / N


def _reference(output1, output2, label, margin=MARGIN, eps=EPS):
    diff = output1 - output2 + eps
    dist = jnp.sqrt(jnp.sum(diff * diff, axis=-1))
    hinge = jnp.maximum(margin - dist, 0.0)
    return jnp.mean((1.0 - label) * dist**2 + label * hinge**2)


if __name__ == "__main__":
    key = jax.random.PRNGKey(0)
    k1, k2, k3 = jax.random.split(key, 3)

    # Case 1: lane-dense feature dim (D multiple of 128), f32, single tile.
    N, D = 16, 128
    o1 = jax.random.normal(k1, (N, D), dtype=jnp.float32)
    o2 = jax.random.normal(k2, (N, D), dtype=jnp.float32)
    lbl = jax.random.bernoulli(k3, 0.5, (N,)).astype(jnp.float32)
    loss = contrastive_loss(o1, o2, lbl)
    jax.block_until_ready(loss)
    ref = _reference(o1, o2, lbl)
    assert jnp.allclose(loss, ref, rtol=1e-4, atol=1e-4), (loss, ref)

    # Case 2: multi-tile grid with a ragged tail (N % 128 != 0) and small D;
    # inputs scaled down so the hinge (label==1) branch is actually non-zero.
    N2, D2 = 300, 32
    o1b = 0.1 * jax.random.normal(k1, (N2, D2), dtype=jnp.float32)
    o2b = 0.1 * jax.random.normal(k2, (N2, D2), dtype=jnp.float32)
    lblb = jax.random.bernoulli(k3, 0.5, (N2,)).astype(jnp.float32)
    loss2 = contrastive_loss(o1b, o2b, lblb, tile_rows=128)
    jax.block_until_ready(loss2)
    ref2 = _reference(o1b, o2b, lblb)
    assert jnp.allclose(loss2, ref2, rtol=1e-4, atol=1e-4), (loss2, ref2)

    # Case 3: bf16 embeddings streamed directly (half the HBM bytes);
    # math is f32 in-kernel so it matches the f32-upcast reference.
    o1h = o1.astype(jnp.bfloat16)
    o2h = o2.astype(jnp.bfloat16)
    loss3 = contrastive_loss(o1h, o2h, lbl)
    jax.block_until_ready(loss3)
    ref3 = _reference(o1h.astype(jnp.float32), o2h.astype(jnp.float32), lbl)
    assert jnp.allclose(loss3, ref3, rtol=1e-4, atol=1e-4), (loss3, ref3)

    print("KERNEL_OK")
</pallas_src>

<mosaic_0001>
module attributes {stable_mosaic.version = 11 : i64} {
  func.func @kernel(%arg0: i32, %arg1: memref<16x128xf32, #tpu.memory_space<vmem>>, %arg2: memref<16x128xf32, #tpu.memory_space<vmem>>, %arg3: memref<1x16xf32, #tpu.memory_space<vmem>>, %arg4: memref<1x16xf32, #tpu.memory_space<vmem>>) attributes {dimension_semantics = [#tpu.dimension_semantics<parallel>], iteration_bounds = array<i64: 1>, scalar_prefetch = 0 : i64, scratch_operands = 0 : i64, tpu.core_type = #tpu.core_type<tc>, window_params = [{transform_indices = @transform_0, window_bounds = array<i64: 16, 128>}, {transform_indices = @transform_1, window_bounds = array<i64: 16, 128>}, {transform_indices = @transform_2, window_bounds = array<i64: 1, 16>}, {transform_indices = @transform_3, window_bounds = array<i64: 1, 16>}]} {
    %c0 = arith.constant 0 : index
    %c0_0 = arith.constant 0 : index
    %0 = vector.load %arg1[%c0, %c0_0] : memref<16x128xf32, #tpu.memory_space<vmem>>, vector<16x128xf32>
    %c0_1 = arith.constant 0 : index
    %c0_2 = arith.constant 0 : index
    %1 = vector.load %arg2[%c0_1, %c0_2] : memref<16x128xf32, #tpu.memory_space<vmem>>, vector<16x128xf32>
    %2 = arith.subf %0, %1 : vector<16x128xf32>
    %cst = arith.constant 9.99999997E-7 : f32
    %3 = vector.broadcast %cst : f32 to vector<16x128xf32>
    %4 = arith.addf %2, %3 : vector<16x128xf32>
    %5 = arith.mulf %4, %4 : vector<16x128xf32>
    %cst_3 = arith.constant 1.000000e+00 : f32
    %6 = vector.broadcast %cst_3 : f32 to vector<8x128xf32>
    %cst_4 = arith.constant dense<0.000000e+00> : vector<8x16xf32>
    %7 = tpu.matmul %6, %5, %cst_4 {dimension_numbers = #tpu.dot_dimension_numbers<[1], [1], [0], [0], [0, 0, 1, 0], [], []>} : vector<8x128xf32>, vector<16x128xf32>, vector<8x16xf32> -> vector<8x16xf32>
    %8 = vector.extract_strided_slice %7 {offsets = [0, 0], sizes = [1, 16], strides = [1, 1]} : vector<8x16xf32> to vector<1x16xf32>
    %9 = math.sqrt %8 : vector<1x16xf32>
    %c0_5 = arith.constant 0 : index
    %c0_6 = arith.constant 0 : index
    %10 = vector.load %arg3[%c0_5, %c0_6] : memref<1x16xf32, #tpu.memory_space<vmem>>, vector<1x16xf32>
    %cst_7 = arith.constant 1.500000e+00 : f32
    %11 = vector.broadcast %cst_7 : f32 to vector<1x16xf32>
    %12 = arith.subf %11, %9 : vector<1x16xf32>
    %cst_8 = arith.constant 0.000000e+00 : f32
    %13 = vector.broadcast %cst_8 : f32 to vector<1x16xf32>
    %14 = arith.maximumf %12, %13 : vector<1x16xf32>
    %cst_9 = arith.constant 1.000000e+00 : f32
    %15 = vector.broadcast %cst_9 : f32 to vector<1x16xf32>
    %16 = arith.subf %15, %10 : vector<1x16xf32>
    %17 = arith.mulf %16, %8 : vector<1x16xf32>
    %18 = arith.mulf %14, %14 : vector<1x16xf32>
    %19 = arith.mulf %10, %18 : vector<1x16xf32>
    %20 = arith.addf %17, %19 : vector<1x16xf32>
    %c16_i32 = arith.constant 16 : i32
    %21 = arith.muli %arg0, %c16_i32 : i32
    %22 = tpu.iota {dimensions = array<i32: 1>} : vector<1x16xi32>
    %23 = vector.broadcast %21 : i32 to vector<1x16xi32>
    %24 = arith.addi %23, %22 : vector<1x16xi32>
    %c16_i32_10 = arith.constant 16 : i32
    %25 = vector.broadcast %c16_i32_10 : i32 to vector<1x16xi32>
    %26 = arith.cmpi slt, %24, %25 : vector<1x16xi32>
    %cst_11 = arith.constant 0.000000e+00 : f32
    %27 = vector.broadcast %cst_11 : f32 to vector<1x16xf32>
    %28 = arith.select %26, %20, %27 : vector<1x16xi1>, vector<1x16xf32>
    %c0_12 = arith.constant 0 : index
    %c0_13 = arith.constant 0 : index
    %29 = vector.load %arg4[%c0_12, %c0_13] : memref<1x16xf32, #tpu.memory_space<vmem>>, vector<1x16xf32>
    tpu.vector_store %arg4[%c0_12, %c0_13], %28 {strides = array<i32>} : memref<1x16xf32, #tpu.memory_space<vmem>>, vector<1x16xf32>,
    return
  }
  func.func @transform_0(%arg0: i32) -> (i32, i32) {
    %c0_i32 = arith.constant 0 : i32
    %c0_i32_0 = arith.constant 0 : i32
    return %arg0, %c0_i32 : i32, i32
  }
  func.func @transform_1(%arg0: i32) -> (i32, i32) {
    %c0_i32 = arith.constant 0 : i32
    %c0_i32_0 = arith.constant 0 : i32
    return %arg0, %c0_i32 : i32, i32
  }
  func.func @transform_2(%arg0: i32) -> (i32, i32) {
    %c0_i32 = arith.constant 0 : i32
    %c0_i32_0 = arith.constant 0 : i32
    return %c0_i32, %arg0 : i32, i32
  }
  func.func @transform_3(%arg0: i32) -> (i32, i32) {
    %c0_i32 = arith.constant 0 : i32
    %c0_i32_0 = arith.constant 0 : i32
    return %c0_i32, %arg0 : i32, i32
  }
}

</mosaic_0001>

<bundles_post_ra>
// kernel: tpu_custom_call.1
= control target key start
LH: loop header
LB: loop body
LE: loop exit
PB: predicated region body
PF: predicated region fallthrough
CT: control target
= control target key end

     0   :  { %8 = vsyncpa [#allocation3], 0  ;;  %s327_s0 = inlined_call_operand.hbm [shape: f32[16,128], index: 0, kind: input, shape index: {}]   ;;  %s328_s1 = inlined_call_operand.hbm [shape: f32[16,128], index: 1, kind: input, shape index: {}]   ;;  %s329_s2 = inlined_call_operand.vmem [shape: f32[1,16], index: 2, kind: input, shape index: {}]   ;;  %s330_s3 = inlined_call_operand.hbm [shape: f32[1,16], index: 3, kind: output, shape index: {}]  }
   0x1   :  { %9 = vsyncpa [#allocation6], 0 }
   0x2   :  { %10 = vsyncpa [#allocation4], 0  ;;  %s259_s12 = smov [#allocation2]   ;;  %s187_s16 = scalar_lea.hbm %s327_s0, 256 }
   0x3   :  { %s16_s13 = sshll.u32 %s259_s12, 4  ;;  %p188_p0 = scmp.ne.s32.totalorder %s327_s0, %s187_s16  ;;  %s17_s13 = int_to_ptr.vmem [resolvable:$true] %s16_s13 }
   0x4   :  { %p191_p1 = scmp.lt.u32.totalorder %s187_s16, %s327_s0 }
   0x6   :  { %p193_p2 = pnand %p191_p1, %p188_p0 }
   0x8   :  { %196 = shalt.err (!%p193_p2)
}
   0x9   :  { %s197_s21 = scalar_lea.vmem %s17_s13, 256  ;;  %p202_p4 = scmp.lt.s32.totalorder %s17_s13, %s17_s13 }
   0xa   :  { %p198_p3 = scmp.ne.s32.totalorder %s17_s13, %s197_s21  ;;  %p203_p5 = scmp.lt.s32.totalorder %s197_s21, %s197_s21 }
   0xc   :  { %p204_p6 = por %p203_p5, %p202_p4 }
   0xe   :  { %p205_p7 = pnand %p204_p6, %p198_p3 }
  0x10   :  { %208 = shalt.err (!%p205_p7)
}
  0x11   :  { %s260_s22 = smov 128   ;;  %s261_s23 = smov 8  }
  0x12   :  { %22 = dma.hbm_to_vmem [thread:$0]  %s327_s0, 256, %s17_s13, [#allocation3], %s260_s22, %s260_s22, %s261_s23  }
  0x13   :  { %s262_s26 = smov [#allocation5]   ;;  %s209_s30 = scalar_lea.hbm %s328_s1, 256 }
  0x14   :  { %s28_s27 = sshll.u32 %s262_s26, 4  ;;  %p210_p8 = scmp.ne.s32.totalorder %s328_s1, %s209_s30  ;;  %s29_s27 = int_to_ptr.vmem [resolvable:$true] %s28_s27 }
  0x15   :  { %p213_p9 = scmp.lt.u32.totalorder %s209_s30, %s328_s1 }
  0x17   :  { %p215_p10 = pnand %p213_p9, %p210_p8 }
  0x19   :  { %218 = shalt.err (!%p215_p10)
}
  0x1a   :  { %s219_s8 = scalar_lea.vmem %s29_s27, 256  ;;  %p224_p12 = scmp.lt.s32.totalorder %s29_s27, %s29_s27 }
  0x1b   :  { %p220_p11 = scmp.ne.s32.totalorder %s29_s27, %s219_s8  ;;  %p225_p13 = scmp.lt.s32.totalorder %s219_s8, %s219_s8 }
  0x1d   :  { %p226_p0 = por %p225_p13, %p224_p12 }
  0x1f   :  { %p227_p1 = pnand %p226_p0, %p220_p11 }
  0x21   :  { %230 = shalt.err (!%p227_p1)
}
  0x22   :  { %34 = dma.hbm_to_vmem [thread:$0]  %s328_s1, 256, %s29_s27, [#allocation6], %s260_s22, %s260_s22, %s261_s23  }
  0x23   :  { %253 = dma.done.wait [#allocation3], 256  }
  0x24   :  { %254 = vsyncadd [#allocation3], 4294967040 }
  0x25   :  { %255 = dma.done.wait [#allocation6], 256  }
  0x26   :  { %256 = vsyncadd [#allocation6], 4294967040  ;;  %v263_v0 = vmov 0.0|0.0   ;;  %vm264_vm0 = vmmov 0   ;;  %v265_v1 = vmov 0.0   ;;  %v43_v2 = vld [vmem:[#allocation2] sm:$0xff]  ;;  %v139_v22 = vlaneseq }
  0x27   :  { %173 = vmatprep.subr.bf16.mxu0 %v263_v0  ;;  %170 = vmatprep.mubr.msk.f32.mxu0 %vm264_vm0, %v265_v1  ;;  %v44_v3 = vld [vmem:[#allocation2 + $0x8] sm:$0xff]  ;;  %v45_v4 = vld [vmem:[#allocation5] sm:$0xff]  ;;  %v46_v5 = vld [vmem:[#allocation5 + $0x8] sm:$0xff]  ;;  %v266_v13 = vmov 1.0   ;;  %s267_s11 = smov [#allocation7]   ;;  %vm145_vm4 = vcmask 122880  }
  0x28   :  { %v47_v6 = vsub.f32 %v43_v2, %v45_v4  ;;  %v48_v7 = vsub.f32 %v44_v3, %v46_v5  ;;  %v130_v21 = vld [vmem:[%s329_s2] sm:$0x1]  ;;  %v140_v26 = vand.u32 127, %v139_v22  ;;  %s153_s12 = sshll.u32 %s267_s11, 4  ;;  %s154_s12 = int_to_ptr.vmem [resolvable:$true] %s153_s12 }
  0x29   :  { %v133_v25 = vsub.f32 1.0, %v130_v21  ;;  %s231_s13 = scalar_lea.vmem %s154_s12, 16  ;;  %s235_s14 = scalar_lea.vmem %s154_s12, 32 }
  0x2a   :  { %v49_v8 = vadd.f32 1e-06, %v47_v6  ;;  %v50_v9 = vadd.f32 1e-06, %v48_v7  ;;  %vm143_vm3 = vcmp.lt.s32.totalorder %v140_v26, 16  ;;  %p232_p2 = scmp.ne.s32.totalorder %s154_s12, %s231_s13  ;;  %p236_p3 = scmp.lt.s32.totalorder %s154_s12, %s154_s12 }
  0x2b   :  { %p237_p4 = scmp.lt.s32.totalorder %s235_s14, %s231_s13 }
  0x2c   :  { %v51_v10 = vmul.f32 %v49_v8, %v49_v8  ;;  %v52_v11 = vmul.f32 %v50_v9, %v50_v9 }
  0x2d   :  { %p238_p5 = por %p237_p4, %p236_p3 }
  0x2e   :  { %v174_v12 = vpack.c.bf16 %v52_v11, %v51_v10 }
  0x2f   :  { %p239_p6 = pnand %p238_p5, %p232_p2 }
  0x30   :  { %175 = vmatpush3.bf16.xpose.msra.mxu0 %v174_v12 }
  0x37   :  { %171 = vmatmul.mubr.f32.vlgmr.msra.gmra.mrb[0].mxu0 %v266_v13 }
 0x10a   :  { %v119_v14 = vpop.f32.mrb[0].mxu0 }
 0x10b   :  { %185 = vrsqrt.f32 %v119_v14  ;;  %v172_v15 = vpop.f32.mrb[1].mxu0  ;;  %vm125_vm1 = vcmp.eq.f32.partialorder %v119_v14, inf  ;;  %v128_v18 = vand.u32 2147483648, %v119_v14  ;;  %vm127_vm2 = vcmp.eq.f32.partialorder %v119_v14, 0.0 }
 0x10c   :  { %v134_v28 = vmul.f32 %v133_v25, %v119_v14 }
 0x115   :  { %v186_v16 = vpop.eup %185 }
 0x116   :  { %v124_v17 = vmul.f32 %v186_v16, %v119_v14 }
 0x118   :  { %v126_v19 = vsel %vm125_vm1, %v119_v14, %v124_v17 }
 0x119   :  { %v129_v20 = vsel %vm127_vm2, %v128_v18, %v126_v19 }
 0x11a   :  { %v131_v23 = vsub.f32 1.5, %v129_v20 }
 0x11c   :  { %v132_v24 = vmax.f32 %v131_v23, 0.0 }
 0x11e   :  { %v135_v27 = vmul.f32 %v132_v24, %v132_v24 }
 0x120   :  { %v136_v29 = vmul.f32 %v135_v27, %v130_v21 }
 0x122   :  { %v137_v30 = vadd.f32 %v136_v29, %v134_v28 }
 0x124   :  { %v144_v31 = vsel %vm143_vm3, %v137_v30, 0.0 }
 0x125   :  { %146 = vst.msk [vmem:[#allocation7] sm:$0x1] %vm145_vm4, %v144_v31 }
 0x126   :  { %242 = shalt.err (!%p239_p6)
}
 0x127   :  { %s243_s16 = scalar_lea.hbm %s330_s3, 16 }
 0x128   :  { %p244_p7 = scmp.ne.s32.totalorder %s330_s3, %s243_s16  ;;  %p247_p8 = scmp.lt.u32.totalorder %s243_s16, %s330_s3 }
 0x12a   :  { %p249_p9 = pnand %p247_p8, %p244_p7 }
 0x12c   :  { %252 = shalt.err (!%p249_p9)
}
 0x12d   :  { %156 = dma.vmem_to_hbm [thread:$0]  %s154_s12, 16, %s330_s3, [#allocation4]  }
 0x12e   :  { %257 = dma.done.wait [#allocation4], 16  }
 0x12f   :  { %258 = vsyncadd [#allocation4], 4294967280 }
 0x130   :  { %160 = vsyncpa [#allocation3], 1 }
 0x131   :  { %161 = vsyncpa [#allocation6], 1 }
 0x132   :  { %162 = vsyncpa [#allocation4], 1 }

</bundles_post_ra>
